<compile_context>
chip_gen: v7x
topology: tpu7x:2x2x1
jax: 0.10.0
libtpu: 0.0.40
codegen_flags: <defaults>
</compile_context>

<pallas_src>
import functools

import jax
import jax.numpy as jnp
from jax.experimental import pallas as pl
from jax.experimental.pallas import tpu as pltpu


LN_EPS = 1e-5


def _round_up(x, m):
    return ((x + m - 1) // m) * m


# ---------------------------------------------------------------------------
# Kernels
# ---------------------------------------------------------------------------
def _head_epilogue(h, pb_ref, wh_ref, out_ref, inv_e):
    """SiLU -> LayerNorm -> fused [sent | clas] head matmul for one row tile.

    h      : (tm, E_pad) f32   fc matmul result (padded cols are exactly zero)
    pb_ref : (4, E_pad)  f32   rows: b_fc, ln_gamma, ln_beta, fused head bias
    wh_ref : (E_pad, NOUT_pad) fused head weight (zero padded)
    out_ref: (tm, NOUT_pad)    lane-dense fused head output (bf16)
    """
    h = h + pb_ref[0:1, :]                       # + b_fc (zero on padded cols)
    h = h * jax.nn.sigmoid(h)                    # SiLU (f32, VPU + EUP)

    # LayerNorm over the REAL E columns: padded h columns are exactly zero, so
    # sums over E_pad equal sums over E; divide by the real E via inv_e.
    # Single pass over h for both reductions.
    mean = jnp.sum(h, axis=-1, keepdims=True) * inv_e
    var = jnp.sum(h * h, axis=-1, keepdims=True) * inv_e - mean * mean
    var = jnp.maximum(var, 0.0)                  # guard E[h^2]-mean^2 cancellation
    hn = (h - mean) * jax.lax.rsqrt(var + LN_EPS)
    hn = hn * pb_ref[1:2, :] + pb_ref[2:3, :]    # affine; padded cols -> 0

    # Fused heads: one lane-dense (tm, 128) matmul instead of 4-/10-wide stores.
    out = jnp.dot(hn.astype(wh_ref.dtype), wh_ref[...],
                  preferred_element_type=jnp.float32)
    out = out + pb_ref[3:4, :out_ref.shape[-1]]  # fused [b_sent | b_clas] bias
    out_ref[...] = out.astype(out_ref.dtype)


def _kernel_single(x_ref, w1_ref, pb_ref, wh_ref, out_ref, *, inv_e):
    """Whole fc weight resident in VMEM (grid = (row_tiles, 1))."""
    x = x_ref[...].astype(w1_ref.dtype)          # VPU cast, hidden under the MXU
    h = jnp.dot(x, w1_ref[...], preferred_element_type=jnp.float32)
    _head_epilogue(h, pb_ref, wh_ref, out_ref, inv_e)


def _kernel_ktiled(x_ref, w1_ref, pb_ref, wh_ref, out_ref, acc_ref, *, inv_e):
    """fc contraction tiled over K (grid = (row_tiles, nk)); h accumulated in VMEM."""
    k = pl.program_id(1)

    @pl.when(k == 0)
    def _():
        acc_ref[...] = jnp.zeros_like(acc_ref)

    x = x_ref[...].astype(w1_ref.dtype)
    acc_ref[...] += jnp.dot(x, w1_ref[...], preferred_element_type=jnp.float32)

    @pl.when(k == pl.num_programs(1) - 1)
    def _():
        _head_epilogue(acc_ref[...], pb_ref, wh_ref, out_ref, inv_e)


# ---------------------------------------------------------------------------
# Parameter prep (one-time, outside the per-call path)
# ---------------------------------------------------------------------------
def prepare_params(params, *, compute_dtype=jnp.bfloat16):
    """Pre-transpose / concatenate / zero-pad the weights once.

    - fc weight stored (in, out), zero-padded to (E_pad, E_pad), compute dtype
    - sent/clas weights concatenated into one (E_pad, NOUT_pad) padded weight
    - b_fc / ln_gamma / ln_beta / fused head bias packed into a (4, E_pad) f32 block
    E_pad is round_up(E, 128) only (no extra padding for small E).
    """
    E = params["fc_w"].shape[1]
    n_sent = params["sent_w"].shape[0]
    n_clas = params["clas_w"].shape[0]
    E_pad = _round_up(E, 128)
    NOUT_pad = _round_up(n_sent + n_clas, 128)
    assert NOUT_pad <= E_pad  # fused head bias row lives inside the (4, E_pad) block

    w1 = jnp.zeros((E_pad, E_pad), compute_dtype)
    w1 = w1.at[:E, :E].set(params["fc_w"].T.astype(compute_dtype))

    wh = jnp.zeros((E_pad, NOUT_pad), compute_dtype)
    wh = wh.at[:E, :n_sent].set(params["sent_w"].T.astype(compute_dtype))
    wh = wh.at[:E, n_sent:n_sent + n_clas].set(params["clas_w"].T.astype(compute_dtype))

    pb = jnp.zeros((4, E_pad), jnp.float32)
    pb = pb.at[0, :E].set(params["fc_b"].astype(jnp.float32))
    pb = pb.at[1, :E].set(params["ln_g"].astype(jnp.float32))
    pb = pb.at[2, :E].set(params["ln_b"].astype(jnp.float32))
    pb = pb.at[3, :n_sent].set(params["sent_b"].astype(jnp.float32))
    pb = pb.at[3, n_sent:n_sent + n_clas].set(params["clas_b"].astype(jnp.float32))

    return {
        "w1": w1, "wh": wh, "pb": pb,
        "E": E, "E_pad": E_pad,
        "n_sent": n_sent, "n_clas": n_clas,
        "compute_dtype": compute_dtype,
    }


# ---------------------------------------------------------------------------
# Tile planning / VMEM budgeting
# ---------------------------------------------------------------------------
def _vmem_cap_bytes():
    """Per-generation VMEM budget: 3/4 of physical (96 MiB v5e/v6e, 48 MiB v7x)."""
    phys = 64 * 1024 * 1024                      # conservative default (v7x per-TC)
    try:
        phys = int(pltpu.get_tpu_info().vmem_capacity_bytes)
    except Exception:
        pass
    return (phys * 3) // 4


def _plan_tiles(R, E_pad, NOUT_pad, *, tile_rows, tile_k,
                x_isz, w_isz, out_isz, vmem_cap):
    """Pick (tm, tk, nk) so the resident footprint fits under vmem_cap."""
    # Row tile: multiple of 16 (bf16 sublane packing), capped at 512 for vreg
    # pressure; keep at least two row tiles when R allows (v7x's two TensorCores).
    tm = min(_round_up(max(tile_rows, 16), 16), 512)
    two_tiles = _round_up(-(-R // 2), 16)
    tm = max(16, min(tm, two_tiles))

    def est_vmem(tm_, tk_, nk_):
        x_buf = 2 * tm_ * tk_ * x_isz                       # row tiles, double buffered
        w1_buf = (1 if nk_ == 1 else 2) * tk_ * E_pad * w_isz
        pb_buf = 4 * E_pad * 4                              # single buffered (const idx)
        wh_buf = E_pad * NOUT_pad * w_isz                   # single buffered (const idx)
        out_buf = 2 * tm_ * NOUT_pad * out_isz
        acc_buf = 0 if nk_ == 1 else tm_ * E_pad * 4        # f32 h accumulator scratch
        interm = 3 * tm_ * E_pad * 4                        # h / hn f32 working set
        return x_buf + w1_buf + pb_buf + wh_buf + out_buf + acc_buf + interm

    if tile_k is not None:
        assert tile_k % 128 == 0 and E_pad % tile_k == 0
        return tm, tile_k, E_pad // tile_k

    # Largest K tile (fewest grid steps) whose footprint fits under the cap;
    # shrink the row tile if even tk=128 does not fit. Never silently truncate.
    while True:
        for tk in range(E_pad, 0, -128):
            if E_pad % tk:
                continue
            nk = E_pad // tk
            if est_vmem(tm, tk, nk) <= vmem_cap:
                return tm, tk, nk
        if tm <= 16:
            raise ValueError(
                "Linear2HEAD kernel does not fit in VMEM even with tm=16, tk=128; "
                "embedding_dim is too large for this kernel layout.")
        tm = max(16, _round_up(tm // 2, 16))


# ---------------------------------------------------------------------------
# pallas_call builder + forward
# ---------------------------------------------------------------------------
def _build_and_call(x2d, w1, pb, wh, *, tm, tk, nk, R_pad, E_pad, NOUT_pad,
                    inv_e, out_dtype, vmem_limit, single_buffer_consts):
    def const2d(shape):
        # Constant index_map => double-buffering buys zero pipelining; single-buffer
        # to halve resident weight VMEM.
        if single_buffer_consts:
            return pl.BlockSpec(shape, lambda i, k: (0, 0),
                                pipeline_mode=pl.Buffered(1))
        return pl.BlockSpec(shape, lambda i, k: (0, 0))

    if nk == 1:
        w1_spec = const2d((E_pad, E_pad))
        kernel = functools.partial(_kernel_single, inv_e=inv_e)
        scratch = []
    else:
        # K-streamed fc weight: block index varies with k -> keep default
        # double-buffering so the next K tile streams behind the MXU.
        w1_spec = pl.BlockSpec((tk, E_pad), lambda i, k: (k, 0))
        kernel = functools.partial(_kernel_ktiled, inv_e=inv_e)
        scratch = [pltpu.VMEM((tm, E_pad), jnp.float32)]

    return pl.pallas_call(
        kernel,
        out_shape=jax.ShapeDtypeStruct((R_pad, NOUT_pad), out_dtype),
        grid_spec=pltpu.PrefetchScalarGridSpec(
            num_scalar_prefetch=0,
            grid=(R_pad // tm, nk),
            in_specs=[
                pl.BlockSpec((tm, tk), lambda i, k: (i, k)),   # activation rows
                w1_spec,                                       # fc weight
                const2d((4, E_pad)),                           # packed biases / LN params
                const2d((E_pad, NOUT_pad)),                    # fused head weight
            ],
            out_specs=pl.BlockSpec((tm, NOUT_pad), lambda i, k: (i, 0)),
            scratch_shapes=scratch,
        ),
        compiler_params=pltpu.CompilerParams(
            dimension_semantics=("parallel", "arbitrary"),  # rows shard across v7x's 2 TCs
            vmem_limit_bytes=int(vmem_limit),
        ),
    )(x2d, w1, pb, wh)


def linear2head_forward(encoded, prepped, *, tile_rows=256, tile_k=None):
    """encoded: (B, S, E) float array. prepped: output of prepare_params()."""
    B, S, E = encoded.shape
    assert E == prepped["E"], "embedding_dim mismatch with prepared params"
    E_pad = prepped["E_pad"]
    NOUT_pad = prepped["wh"].shape[1]
    n_sent, n_clas = prepped["n_sent"], prepped["n_clas"]
    compute_dtype = prepped["compute_dtype"]

    R = B * S
    vmem_cap = _vmem_cap_bytes()
    w_isz = jnp.dtype(compute_dtype).itemsize
    x_isz = max(jnp.dtype(encoded.dtype).itemsize, w_isz)   # conservative estimate
    out_dtype = compute_dtype                                # bf16 output: half the store traffic
    out_isz = jnp.dtype(out_dtype).itemsize

    tm, tk, nk = _plan_tiles(R, E_pad, NOUT_pad, tile_rows=tile_rows, tile_k=tile_k,
                             x_isz=x_isz, w_isz=w_isz, out_isz=out_isz,
                             vmem_cap=vmem_cap)
    R_pad = _round_up(R, tm)

    x2d = encoded.reshape(R, E)
    if R_pad != R or E_pad != E:
        # Fuse the bf16 cast into the pad: exactly one pass over the activations.
        x2d = jnp.pad(x2d.astype(compute_dtype),
                      ((0, R_pad - R), (0, E_pad - E)))
    # else: feed the source dtype; the kernel casts to bf16 on the VPU (no
    # separate XLA convert pass over the activations).

    call_kwargs = dict(tm=tm, tk=tk, nk=nk, R_pad=R_pad, E_pad=E_pad,
                       NOUT_pad=NOUT_pad, inv_e=1.0 / float(E),
                       out_dtype=out_dtype, vmem_limit=vmem_cap)
    try:
        out2d = _build_and_call(x2d, prepped["w1"], prepped["pb"], prepped["wh"],
                                single_buffer_consts=True, **call_kwargs)
    except Exception:
        # pipeline_mode / pl.Buffered(1) unavailable in this jax build: fall back
        # to default double buffering (correct, just uses more VMEM).
        out2d = _build_and_call(x2d, prepped["w1"], prepped["pb"], prepped["wh"],
                                single_buffer_consts=False, **call_kwargs)

    sent = out2d[:R, :n_sent].reshape(B, S, n_sent).astype(encoded.dtype)
    clas = out2d[:R, n_sent:n_sent + n_clas].reshape(B, S, n_clas).astype(encoded.dtype)
    return sent, clas


# ---------------------------------------------------------------------------
# Reference, init, tests
# ---------------------------------------------------------------------------
def init_params(key, embedding_dim):
    """Deterministic synthetic init matching nn.Linear / nn.LayerNorm shapes."""
    E = embedding_dim
    ks = jax.random.split(key, 6)
    scale = 1.0 / jnp.sqrt(E)
    return {
        "fc_w":  jax.random.uniform(ks[0], (E, E), jnp.float32, -scale, scale),
        "fc_b":  jax.random.uniform(ks[1], (E,),   jnp.float32, -scale, scale),
        "ln_g":  jnp.ones((E,), jnp.float32),
        "ln_b":  jnp.zeros((E,), jnp.float32),
        "sent_w": jax.random.uniform(ks[2], (4, E),  jnp.float32, -scale, scale),
        "sent_b": jax.random.uniform(ks[3], (4,),    jnp.float32, -scale, scale),
        "clas_w": jax.random.uniform(ks[4], (10, E), jnp.float32, -scale, scale),
        "clas_b": jax.random.uniform(ks[5], (10,),   jnp.float32, -scale, scale),
    }


def reference_forward(encoded, params, compute_dtype=None):
    """Pure-JAX reference of the PyTorch forward (optionally bf16 matmul operands)."""
    x, w1 = encoded, params["fc_w"].T
    ws, wc = params["sent_w"].T, params["clas_w"].T
    if compute_dtype is not None:
        x, w1 = x.astype(compute_dtype), w1.astype(compute_dtype)
        ws, wc = ws.astype(compute_dtype), wc.astype(compute_dtype)
    h = jnp.dot(x, w1, preferred_element_type=jnp.float32) + params["fc_b"]
    h = h * jax.nn.sigmoid(h)
    mean = jnp.mean(h, axis=-1, keepdims=True)
    var = jnp.mean(jnp.square(h - mean), axis=-1, keepdims=True)
    hn = (h - mean) * jax.lax.rsqrt(var + LN_EPS)
    hn = hn * params["ln_g"] + params["ln_b"]
    hn_c = hn.astype(compute_dtype) if compute_dtype is not None else hn
    sent = jnp.dot(hn_c, ws, preferred_element_type=jnp.float32) + params["sent_b"]
    clas = jnp.dot(hn_c, wc, preferred_element_type=jnp.float32) + params["clas_b"]
    return sent, clas


def _run_case(k_x, k_p, B, S, E, *, tile_rows=256, tile_k=None):
    encoded = jax.random.normal(k_x, (B, S, E), jnp.float32)
    params = init_params(k_p, E)
    prepped = prepare_params(params, compute_dtype=jnp.bfloat16)

    sent, clas = linear2head_forward(encoded, prepped,
                                     tile_rows=tile_rows, tile_k=tile_k)
    sent, clas = jax.block_until_ready((sent, clas))

    assert sent.shape == (B, S, 4) and clas.shape == (B, S, 10)

    # Check vs a reference mirroring the kernel's bf16 matmul precision
    # (tolerance also covers the bf16 output rounding of the 14 logits).
    ref_s, ref_c = reference_forward(encoded, params, compute_dtype=jnp.bfloat16)
    assert jnp.allclose(sent, ref_s, atol=2e-2, rtol=2e-2), \
        f"sent mismatch: {float(jnp.max(jnp.abs(sent - ref_s)))}"
    assert jnp.allclose(clas, ref_c, atol=2e-2, rtol=2e-2), \
        f"clas mismatch: {float(jnp.max(jnp.abs(clas - ref_c)))}"

    # Looser sanity check vs the pure-f32 reference.
    ref_s32, ref_c32 = reference_forward(encoded, params)
    assert jnp.allclose(sent, ref_s32, atol=1.5e-1, rtol=1.5e-1)
    assert jnp.allclose(clas, ref_c32, atol=1.5e-1, rtol=1.5e-1)


if __name__ == "__main__":
    key = jax.random.PRNGKey(0)
    ks = jax.random.split(key, 6)

    # Module-spec shape: batch=2, seq=8, hidden=32 (E padded 32 -> 128).
    _run_case(ks[0], ks[1], B=2, S=8, E=32)

    # Row padding (120 -> 128), E padding (96 -> 128), 2-tile parallel row grid.
    _run_case(ks[2], ks[3], B=3, S=40, E=96)

    # Forced K-tiling (E_pad=256, tk=128 -> nk=2): exercises the f32 VMEM
    # accumulator path and the in-kernel f32->bf16 activation cast (no padding).
    _run_case(ks[4], ks[5], B=2, S=64, E=256, tile_k=128)

    print("KERNEL_OK")
</pallas_src>

<mosaic_0001>
module attributes {stable_mosaic.version = 11 : i64} {
  func.func @_kernel_single(%arg0: i32, %arg1: i32, %arg2: memref<16x128xbf16, #tpu.memory_space<vmem>>, %arg3: memref<128x128xbf16, #tpu.memory_space<vmem>>, %arg4: memref<4x128xf32, #tpu.memory_space<vmem>>, %arg5: memref<128x128xbf16, #tpu.memory_space<vmem>>, %arg6: memref<16x128xbf16, #tpu.memory_space<vmem>>) attributes {dimension_semantics = [#tpu.dimension_semantics<parallel>, #tpu.dimension_semantics<arbitrary>], iteration_bounds = array<i64: 1, 1>, scalar_prefetch = 0 : i64, scratch_operands = 0 : i64, tpu.core_type = #tpu.core_type<tc>, window_params = [{transform_indices = @transform_0, window_bounds = array<i64: 16, 128>}, {pipeline_mode = #tpu.pipeline_mode<synchronous>, transform_indices = @transform_1, window_bounds = array<i64: 128, 128>}, {pipeline_mode = #tpu.pipeline_mode<synchronous>, transform_indices = @transform_2, window_bounds = array<i64: 4, 128>}, {pipeline_mode = #tpu.pipeline_mode<synchronous>, transform_indices = @transform_3, window_bounds = array<i64: 128, 128>}, {transform_indices = @transform_4, window_bounds = array<i64: 16, 128>}]} {
    %c0 = arith.constant 0 : index
    %c0_0 = arith.constant 0 : index
    %0 = vector.load %arg2[%c0, %c0_0] : memref<16x128xbf16, #tpu.memory_space<vmem>>, vector<16x128xbf16>
    %c0_1 = arith.constant 0 : index
    %c0_2 = arith.constant 0 : index
    %1 = vector.load %arg3[%c0_1, %c0_2] : memref<128x128xbf16, #tpu.memory_space<vmem>>, vector<128x128xbf16>
    %cst = arith.constant dense<0.000000e+00> : vector<16x128xf32>
    %2 = tpu.matmul %0, %1, %cst {dimension_numbers = #tpu.dot_dimension_numbers<[1], [0], [0], [1], [0, 0, 1, 1], [], []>} : vector<16x128xbf16>, vector<128x128xbf16>, vector<16x128xf32> -> vector<16x128xf32>
    %c0_3 = arith.constant 0 : index
    %c0_4 = arith.constant 0 : index
    %3 = vector.load %arg4[%c0_3, %c0_4] : memref<4x128xf32, #tpu.memory_space<vmem>>, vector<1x128xf32>
    %4 = vector.broadcast %3 : vector<1x128xf32> to vector<16x128xf32>
    %5 = arith.addf %2, %4 : vector<16x128xf32>
    %6 = arith.negf %5 : vector<16x128xf32>
    %7 = math.exp %6 : vector<16x128xf32>
    %cst_5 = arith.constant 1.000000e+00 : f32
    %8 = vector.broadcast %cst_5 : f32 to vector<16x128xf32>
    %9 = arith.addf %8, %7 : vector<16x128xf32>
    %10 = arith.divf %8, %9 : vector<16x128xf32>
    %11 = arith.mulf %5, %10 : vector<16x128xf32>
    %cst_6 = arith.constant dense<0.000000e+00> : vector<16xf32>
    %12 = vector.multi_reduction <add>, %11, %cst_6 [1] : vector<16x128xf32> to vector<16xf32>
    %13 = vector.shape_cast %12 : vector<16xf32> to vector<16x1xf32>
    %cst_7 = arith.constant 3.125000e-02 : f32
    %14 = vector.broadcast %cst_7 : f32 to vector<16x1xf32>
    %15 = arith.mulf %13, %14 : vector<16x1xf32>
    %16 = arith.mulf %11, %11 : vector<16x128xf32>
    %cst_8 = arith.constant dense<0.000000e+00> : vector<16xf32>
    %17 = vector.multi_reduction <add>, %16, %cst_8 [1] : vector<16x128xf32> to vector<16xf32>
    %18 = vector.shape_cast %17 : vector<16xf32> to vector<16x1xf32>
    %cst_9 = arith.constant 3.125000e-02 : f32
    %19 = vector.broadcast %cst_9 : f32 to vector<16x1xf32>
    %20 = arith.mulf %18, %19 : vector<16x1xf32>
    %21 = arith.mulf %15, %15 : vector<16x1xf32>
    %22 = arith.subf %20, %21 : vector<16x1xf32>
    %cst_10 = arith.constant 0.000000e+00 : f32
    %23 = vector.broadcast %cst_10 : f32 to vector<16x1xf32>
    %24 = arith.maximumf %22, %23 : vector<16x1xf32>
    %25 = vector.broadcast %15 : vector<16x1xf32> to vector<16x128xf32>
    %26 = arith.subf %11, %25 : vector<16x128xf32>
    %cst_11 = arith.constant 9.99999974E-6 : f32
    %27 = vector.broadcast %cst_11 : f32 to vector<16x1xf32>
    %28 = arith.addf %24, %27 : vector<16x1xf32>
    %29 = math.rsqrt %28 : vector<16x1xf32>
    %30 = vector.broadcast %29 : vector<16x1xf32> to vector<16x128xf32>
    %31 = arith.mulf %26, %30 : vector<16x128xf32>
    %c1 = arith.constant 1 : index
    %c0_12 = arith.constant 0 : index
    %32 = vector.load %arg4[%c1, %c0_12] : memref<4x128xf32, #tpu.memory_space<vmem>>, vector<1x128xf32>
    %33 = vector.broadcast %32 : vector<1x128xf32> to vector<16x128xf32>
    %34 = arith.mulf %31, %33 : vector<16x128xf32>
    %c2 = arith.constant 2 : index
    %c0_13 = arith.constant 0 : index
    %35 = vector.load %arg4[%c2, %c0_13] : memref<4x128xf32, #tpu.memory_space<vmem>>, vector<1x128xf32>
    %36 = vector.broadcast %35 : vector<1x128xf32> to vector<16x128xf32>
    %37 = arith.addf %34, %36 : vector<16x128xf32>
    %38 = arith.truncf %37 : vector<16x128xf32> to vector<16x128xbf16>
    %c0_14 = arith.constant 0 : index
    %c0_15 = arith.constant 0 : index
    %39 = vector.load %arg5[%c0_14, %c0_15] : memref<128x128xbf16, #tpu.memory_space<vmem>>, vector<128x128xbf16>
    %cst_16 = arith.constant dense<0.000000e+00> : vector<16x128xf32>
    %40 = tpu.matmul %38, %39, %cst_16 {dimension_numbers = #tpu.dot_dimension_numbers<[1], [0], [0], [1], [0, 0, 1, 1], [], []>} : vector<16x128xbf16>, vector<128x128xbf16>, vector<16x128xf32> -> vector<16x128xf32>
    %c3 = arith.constant 3 : index
    %c0_17 = arith.constant 0 : index
    %41 = vector.load %arg4[%c3, %c0_17] : memref<4x128xf32, #tpu.memory_space<vmem>>, vector<1x128xf32>
    %42 = vector.broadcast %41 : vector<1x128xf32> to vector<16x128xf32>
    %43 = arith.addf %40, %42 : vector<16x128xf32>
    %44 = arith.truncf %43 : vector<16x128xf32> to vector<16x128xbf16>
    %c0_18 = arith.constant 0 : index
    %c0_19 = arith.constant 0 : index
    %45 = vector.load %arg6[%c0_18, %c0_19] : memref<16x128xbf16, #tpu.memory_space<vmem>>, vector<16x128xbf16>
    tpu.vector_store %arg6[%c0_18, %c0_19], %44 {strides = array<i32>} : memref<16x128xbf16, #tpu.memory_space<vmem>>, vector<16x128xbf16>,
    return
  }
  func.func @transform_0(%arg0: i32, %arg1: i32) -> (i32, i32) {
    %c0_i32 = arith.constant 0 : i32
    return %arg0, %arg1 : i32, i32
  }
  func.func @transform_1(%arg0: i32, %arg1: i32) -> (i32, i32) {
    %c0_i32 = arith.constant 0 : i32
    %c0_i32_0 = arith.constant 0 : i32
    %c0_i32_1 = arith.constant 0 : i32
    return %c0_i32, %c0_i32_0 : i32, i32
  }
  func.func @transform_2(%arg0: i32, %arg1: i32) -> (i32, i32) {
    %c0_i32 = arith.constant 0 : i32
    %c0_i32_0 = arith.constant 0 : i32
    %c0_i32_1 = arith.constant 0 : i32
    return %c0_i32, %c0_i32_0 : i32, i32
  }
  func.func @transform_3(%arg0: i32, %arg1: i32) -> (i32, i32) {
    %c0_i32 = arith.constant 0 : i32
    %c0_i32_0 = arith.constant 0 : i32
    %c0_i32_1 = arith.constant 0 : i32
    return %c0_i32, %c0_i32_0 : i32, i32
  }
  func.func @transform_4(%arg0: i32, %arg1: i32) -> (i32, i32) {
    %c0_i32 = arith.constant 0 : i32
    %c0_i32_0 = arith.constant 0 : i32
    return %arg0, %c0_i32 : i32, i32
  }
}

module attributes {stable_mosaic.version = 11 : i64} {
  func.func @_kernel_single(%arg0: i32, %arg1: i32, %arg2: memref<16x128xbf16, #tpu.memory_space<vmem>>, %arg3: memref<128x128xbf16, #tpu.memory_space<vmem>>, %arg4: memref<4x128xf32, #tpu.memory_space<vmem>>, %arg5: memref<128x128xbf16, #tpu.memory_space<vmem>>, %arg6: memref<16x128xbf16, #tpu.memory_space<vmem>>) attributes {dimension_semantics = [#tpu.dimension_semantics<parallel>, #tpu.dimension_semantics<arbitrary>], iteration_bounds = array<i64: 1, 1>, scalar_prefetch = 0 : i64, scratch_operands = 0 : i64, tpu.core_type = #tpu.core_type<tc>, window_params = [{transform_indices = @transform_0, window_bounds = array<i64: 16, 128>}, {pipeline_mode = #tpu.pipeline_mode<synchronous>, transform_indices = @transform_1, window_bounds = array<i64: 128, 128>}, {pipeline_mode = #tpu.pipeline_mode<synchronous>, transform_indices = @transform_2, window_bounds = array<i64: 4, 128>}, {pipeline_mode = #tpu.pipeline_mode<synchronous>, transform_indices = @transform_3, window_bounds = array<i64: 128, 128>}, {transform_indices = @transform_4, window_bounds = array<i64: 16, 128>}]} {
    %c0 = arith.constant 0 : index
    %c0_0 = arith.constant 0 : index
    %0 = vector.load %arg2[%c0, %c0_0] : memref<16x128xbf16, #tpu.memory_space<vmem>>, vector<16x128xbf16>
    %c0_1 = arith.constant 0 : index
    %c0_2 = arith.constant 0 : index
    %1 = vector.load %arg3[%c0_1, %c0_2] : memref<128x128xbf16, #tpu.memory_space<vmem>>, vector<128x128xbf16>
    %cst = arith.constant dense<0.000000e+00> : vector<16x128xf32>
    %2 = tpu.matmul %0, %1, %cst {dimension_numbers = #tpu.dot_dimension_numbers<[1], [0], [0], [1], [0, 0, 1, 1], [], []>} : vector<16x128xbf16>, vector<128x128xbf16>, vector<16x128xf32> -> vector<16x128xf32>
    %c0_3 = arith.constant 0 : index
    %c0_4 = arith.constant 0 : index
    %3 = vector.load %arg4[%c0_3, %c0_4] : memref<4x128xf32, #tpu.memory_space<vmem>>, vector<1x128xf32>
    %4 = vector.broadcast %3 : vector<1x128xf32> to vector<16x128xf32>
    %5 = arith.addf %2, %4 : vector<16x128xf32>
    %6 = arith.negf %5 : vector<16x128xf32>
    %7 = math.exp %6 : vector<16x128xf32>
    %cst_5 = arith.constant 1.000000e+00 : f32
    %8 = vector.broadcast %cst_5 : f32 to vector<16x128xf32>
    %9 = arith.addf %8, %7 : vector<16x128xf32>
    %10 = arith.divf %8, %9 : vector<16x128xf32>
    %11 = arith.mulf %5, %10 : vector<16x128xf32>
    %cst_6 = arith.constant dense<0.000000e+00> : vector<16xf32>
    %12 = vector.multi_reduction <add>, %11, %cst_6 [1] : vector<16x128xf32> to vector<16xf32>
    %13 = vector.shape_cast %12 : vector<16xf32> to vector<16x1xf32>
    %cst_7 = arith.constant 3.125000e-02 : f32
    %14 = vector.broadcast %cst_7 : f32 to vector<16x1xf32>
    %15 = arith.mulf %13, %14 : vector<16x1xf32>
    %16 = arith.mulf %11, %11 : vector<16x128xf32>
    %cst_8 = arith.constant dense<0.000000e+00> : vector<16xf32>
    %17 = vector.multi_reduction <add>, %16, %cst_8 [1] : vector<16x128xf32> to vector<16xf32>
    %18 = vector.shape_cast %17 : vector<16xf32> to vector<16x1xf32>
    %cst_9 = arith.constant 3.125000e-02 : f32
    %19 = vector.broadcast %cst_9 : f32 to vector<16x1xf32>
    %20 = arith.mulf %18, %19 : vector<16x1xf32>
    %21 = arith.mulf %15, %15 : vector<16x1xf32>
    %22 = arith.subf %20, %21 : vector<16x1xf32>
    %cst_10 = arith.constant 0.000000e+00 : f32
    %23 = vector.broadcast %cst_10 : f32 to vector<16x1xf32>
    %24 = arith.maximumf %22, %23 : vector<16x1xf32>
    %25 = vector.broadcast %15 : vector<16x1xf32> to vector<16x128xf32>
    %26 = arith.subf %11, %25 : vector<16x128xf32>
    %cst_11 = arith.constant 9.99999974E-6 : f32
    %27 = vector.broadcast %cst_11 : f32 to vector<16x1xf32>
    %28 = arith.addf %24, %27 : vector<16x1xf32>
    %29 = math.rsqrt %28 : vector<16x1xf32>
    %30 = vector.broadcast %29 : vector<16x1xf32> to vector<16x128xf32>
    %31 = arith.mulf %26, %30 : vector<16x128xf32>
    %c1 = arith.constant 1 : index
    %c0_12 = arith.constant 0 : index
    %32 = vector.load %arg4[%c1, %c0_12] : memref<4x128xf32, #tpu.memory_space<vmem>>, vector<1x128xf32>
    %33 = vector.broadcast %32 : vector<1x128xf32> to vector<16x128xf32>
    %34 = arith.mulf %31, %33 : vector<16x128xf32>
    %c2 = arith.constant 2 : index
    %c0_13 = arith.constant 0 : index
    %35 = vector.load %arg4[%c2, %c0_13] : memref<4x128xf32, #tpu.memory_space<vmem>>, vector<1x128xf32>
    %36 = vector.broadcast %35 : vector<1x128xf32> to vector<16x128xf32>
    %37 = arith.addf %34, %36 : vector<16x128xf32>
    %38 = arith.truncf %37 : vector<16x128xf32> to vector<16x128xbf16>
    %c0_14 = arith.constant 0 : index
    %c0_15 = arith.constant 0 : index
    %39 = vector.load %arg5[%c0_14, %c0_15] : memref<128x128xbf16, #tpu.memory_space<vmem>>, vector<128x128xbf16>
    %cst_16 = arith.constant dense<0.000000e+00> : vector<16x128xf32>
    %40 = tpu.matmul %38, %39, %cst_16 {dimension_numbers = #tpu.dot_dimension_numbers<[1], [0], [0], [1], [0, 0, 1, 1], [], []>} : vector<16x128xbf16>, vector<128x128xbf16>, vector<16x128xf32> -> vector<16x128xf32>
    %c3 = arith.constant 3 : index
    %c0_17 = arith.constant 0 : index
    %41 = vector.load %arg4[%c3, %c0_17] : memref<4x128xf32, #tpu.memory_space<vmem>>, vector<1x128xf32>
    %42 = vector.broadcast %41 : vector<1x128xf32> to vector<16x128xf32>
    %43 = arith.addf %40, %42 : vector<16x128xf32>
    %44 = arith.truncf %43 : vector<16x128xf32> to vector<16x128xbf16>
    %c0_18 = arith.constant 0 : index
    %c0_19 = arith.constant 0 : index
    %45 = vector.load %arg6[%c0_18, %c0_19] : memref<16x128xbf16, #tpu.memory_space<vmem>>, vector<16x128xbf16>
    tpu.vector_store %arg6[%c0_18, %c0_19], %44 {strides = array<i32>} : memref<16x128xbf16, #tpu.memory_space<vmem>>, vector<16x128xbf16>,
    return
  }
  func.func @transform_0(%arg0: i32, %arg1: i32) -> (i32, i32) {
    %c0_i32 = arith.constant 0 : i32
    return %arg0, %arg1 : i32, i32
  }
  func.func @transform_1(%arg0: i32, %arg1: i32) -> (i32, i32) {
    %c0_i32 = arith.constant 0 : i32
    %c0_i32_0 = arith.constant 0 : i32
    %c0_i32_1 = arith.constant 0 : i32
    return %c0_i32, %c0_i32_0 : i32, i32
  }
  func.func @transform_2(%arg0: i32, %arg1: i32) -> (i32, i32) {
    %c0_i32 = arith.constant 0 : i32
    %c0_i32_0 = arith.constant 0 : i32
    %c0_i32_1 = arith.constant 0 : i32
    return %c0_i32, %c0_i32_0 : i32, i32
  }
  func.func @transform_3(%arg0: i32, %arg1: i32) -> (i32, i32) {
    %c0_i32 = arith.constant 0 : i32
    %c0_i32_0 = arith.constant 0 : i32
    %c0_i32_1 = arith.constant 0 : i32
    return %c0_i32, %c0_i32_0 : i32, i32
  }
  func.func @transform_4(%arg0: i32, %arg1: i32) -> (i32, i32) {
    %c0_i32 = arith.constant 0 : i32
    %c0_i32_0 = arith.constant 0 : i32
    return %arg0, %c0_i32 : i32, i32
  }
}

</mosaic_0001>

<bundles_post_ra>
// kernel: tpu_custom_call.1
= control target key start
LH: loop header
LB: loop body
LE: loop exit
PB: predicated region body
PF: predicated region fallthrough
CT: control target
= control target key end

     0   :  { %9 = vsyncpa [#allocation3], 0  ;;  %s724_s0 = inlined_call_operand.hbm [shape: bf16[16,128], index: 0, kind: input, shape index: {}]   ;;  %s725_s1 = inlined_call_operand.hbm [shape: bf16[128,128], index: 1, kind: input, shape index: {}]   ;;  %s726_s2 = inlined_call_operand.vmem [shape: f32[4,128], index: 2, kind: input, shape index: {}]   ;;  %s727_s3 = inlined_call_operand.hbm [shape: bf16[128,128], index: 3, kind: input, shape index: {}]   ;;  %s728_s4 = inlined_call_operand.hbm [shape: bf16[16,128], index: 4, kind: output, shape index: {}]  }
   0x1   :  { %10 = vsyncpa [#allocation6], 0 }
   0x2   :  { %11 = vsyncpa [#allocation4], 0  ;;  %s594_s15 = smov [#allocation5]   ;;  %s595_s17 = smov [#allocation2]  }
   0x3   :  { %s29_s16 = sshll.u32 %s594_s15, 4  ;;  %s17_s18 = sshll.u32 %s595_s17, 4  ;;  %s30_s16 = int_to_ptr.vmem [resolvable:$true] %s29_s16  ;;  %s627_s18 = int_to_ptr.vmem [resolvable:$true] %s17_s18 }
   0x4   :  { %s500_s21 = scalar_lea.hbm %s725_s1, 1024 }
   0x5   :  { %p501_p0 = scmp.ne.s32.totalorder %s725_s1, %s500_s21  ;;  %p504_p1 = scmp.lt.u32.totalorder %s500_s21, %s725_s1 }
   0x7   :  { %p506_p2 = pnand %p504_p1, %p501_p0 }
   0x9   :  { %509 = shalt.err (!%p506_p2)
}
   0xa   :  { %s510_s26 = scalar_lea.vmem %s30_s16, 1024  ;;  %p515_p4 = scmp.lt.s32.totalorder %s30_s16, %s30_s16 }
   0xb   :  { %p511_p3 = scmp.ne.s32.totalorder %s30_s16, %s510_s26  ;;  %p516_p5 = scmp.lt.s32.totalorder %s510_s26, %s510_s26 }
   0xd   :  { %p517_p6 = por %p516_p5, %p515_p4 }
   0xf   :  { %p518_p7 = pnand %p517_p6, %p511_p3 }
  0x11   :  { %521 = shalt.err (!%p518_p7)
}
  0x12   :  { %s596_s27 = smov 64   ;;  %s597_s28 = smov 4  }
  0x13   :  { %35 = dma.hbm_to_vmem [thread:$0]  %s725_s1, 1024, %s30_s16, [#allocation6], %s596_s27, %s596_s27, %s597_s28  }
  0x14   :  { %s522_s7 = scalar_lea.hbm %s724_s0, 128 }
  0x15   :  { %p523_p8 = scmp.ne.s32.totalorder %s724_s0, %s522_s7  ;;  %p526_p9 = scmp.lt.u32.totalorder %s522_s7, %s724_s0 }
  0x17   :  { %p528_p10 = pnand %p526_p9, %p523_p8 }
  0x19   :  { %531 = shalt.err (!%p528_p10)
}
  0x1a   :  { %s532_s12 = scalar_lea.vmem %s627_s18, 128  ;;  %p537_p12 = scmp.lt.s32.totalorder %s627_s18, %s627_s18 }
  0x1b   :  { %p533_p11 = scmp.ne.s32.totalorder %s627_s18, %s532_s12  ;;  %p538_p13 = scmp.lt.s32.totalorder %s532_s12, %s532_s12 }
  0x1d   :  { %p539_p0 = por %p538_p13, %p537_p12 }
  0x1f   :  { %p540_p1 = pnand %p539_p0, %p533_p11 }
  0x21   :  { %543 = shalt.err (!%p540_p1)
}
  0x22   :  { %23 = dma.hbm_to_vmem [thread:$0]  %s724_s0, 128, %s627_s18, [#allocation3], %s596_s27, %s596_s27, %s597_s28  }
  0x23   :  { %s598_s14 = smov [#allocation7]   ;;  %s544_s19 = scalar_lea.hbm %s727_s3, 1024 }
  0x24   :  { %s43_s15 = sshll.u32 %s598_s14, 4  ;;  %p545_p2 = scmp.ne.s32.totalorder %s727_s3, %s544_s19  ;;  %s44_s15 = int_to_ptr.vmem [resolvable:$true] %s43_s15 }
  0x25   :  { %p548_p3 = scmp.lt.u32.totalorder %s544_s19, %s727_s3 }
  0x27   :  { %p550_p4 = pnand %p548_p3, %p545_p2 }
  0x29   :  { %553 = shalt.err (!%p550_p4)
}
  0x2a   :  { %s554_s24 = scalar_lea.vmem %s44_s15, 1024  ;;  %p559_p6 = scmp.lt.s32.totalorder %s44_s15, %s44_s15 }
  0x2b   :  { %p555_p5 = scmp.ne.s32.totalorder %s44_s15, %s554_s24  ;;  %p560_p7 = scmp.lt.s32.totalorder %s554_s24, %s554_s24 }
  0x2d   :  { %p561_p8 = por %p560_p7, %p559_p6 }
  0x2f   :  { %p562_p9 = pnand %p561_p8, %p555_p5 }
  0x31   :  { %565 = shalt.err (!%p562_p9)
}
  0x32   :  { %49 = dma.hbm_to_vmem [thread:$0]  %s727_s3, 1024, %s44_s15, [#allocation6], %s596_s27, %s596_s27, %s597_s28  }
  0x33   :  { %588 = dma.done.wait [#allocation3], 128  }
  0x34   :  { %589 = vsyncadd [#allocation3], 4294967168 }
  0x35   :  { %590 = dma.done.wait [#allocation6], 2048  }
  0x36   :  { %591 = vsyncadd [#allocation6], 4294965248  ;;  %v599_v0 = vmov 0.0   ;;  %vm600_vm0 = vmmov 0   ;;  %v471_v1 = vld [vmem:[#allocation5] sm:$0xff]   ;;  %v472_v2 = vld [vmem:[#allocation5 + $0x8] sm:$0xff]  }
  0x37   :  { %423 = vmatprep.subr.bf16.mxu0 %v599_v0  ;;  %439 = vmatprep.mubr.msk.bf16.mxu0 %vm600_vm0, %v599_v0  ;;  %v473_v3 = vld [vmem:[#allocation5 + $0x10] sm:$0xff]   ;;  %v474_v4 = vld [vmem:[#allocation5 + $0x18] sm:$0xff]   ;;  %v475_v5 = vld [vmem:[#allocation5 + $0x20] sm:$0xff]   ;;  %s601_s8 = smov [#allocation8]  }
  0x38   :  { %443 = vmatprep.subr.bf16.mxu1 %v599_v0  ;;  %459 = vmatprep.mubr.msk.bf16.mxu1 %vm600_vm0, %v599_v0  ;;  %v476_v6 = vld [vmem:[#allocation5 + $0x28] sm:$0xff]   ;;  %v477_v7 = vld [vmem:[#allocation5 + $0x30] sm:$0xff]   ;;  %v478_v8 = vld [vmem:[#allocation5 + $0x38] sm:$0xff]   ;;  %s360_s9 = sshll.u32 %s601_s8, 4  ;;  %s361_s9 = int_to_ptr.vmem [resolvable:$true] %s360_s9 }
  0x39   :  { %424 = vmatpush3.bf16.msra.mxu0 %v471_v1  ;;  %v479_v9 = vld [vmem:[#allocation2] sm:$0xff]   ;;  %v480_v29 = vld [vmem:[#allocation7] sm:$0xff]   ;;  %v481_v30 = vld [vmem:[#allocation7 + $0x8] sm:$0xff]   ;;  %s566_s10 = scalar_lea.vmem %s361_s9, 128  ;;  %p571_p11 = scmp.lt.s32.totalorder %s361_s9, %s361_s9 }
  0x3a   :  { %425 = vmatprep.subr.bf16.mxu0 %v599_v0  ;;  %v373_v10 = vld [vmem:[%s726_s2] ss:$0 sm:$0xff]  ;;  %444 = vmatpush3.bf16.msra.mxu1 %v480_v29  ;;  %v482_v31 = vld [vmem:[#allocation7 + $0x10] sm:$0xff]   ;;  %v484_v33 = vld [vmem:[#allocation7 + $0x20] sm:$0xff]   ;;  %p567_p10 = scmp.ne.s32.totalorder %s361_s9, %s566_s10  ;;  %p572_p12 = scmp.lt.s32.totalorder %s566_s10, %s566_s10 }
  0x3b   :  { %445 = vmatprep.subr.bf16.mxu1 %v599_v0  ;;  %v483_v32 = vld [vmem:[#allocation7 + $0x18] sm:$0xff]   ;;  %v485_v34 = vld [vmem:[#allocation7 + $0x28] sm:$0xff]   ;;  %v486_v35 = vld [vmem:[#allocation7 + $0x30] sm:$0xff]  }
  0x3c   :  { %v487_v36 = vld [vmem:[#allocation7 + $0x38] sm:$0xff]   ;;  %p573_p13 = por %p572_p12, %p571_p11 }
  0x3d   :  { %426 = vmatpush3.bf16.msra.mxu0 %v472_v2  ;;  %v385_v56 = vld [vmem:[%s726_s2 + $0x1] ss:$0 sm:$0xff]  ;;  %v386_v61 = vld [vmem:[%s726_s2 + $0x2] ss:$0 sm:$0xff]  ;;  %v387_v2 = vld [vmem:[%s726_s2 + $0x3] ss:$0 sm:$0xff] }
  0x3e   :  { %427 = vmatprep.subr.bf16.mxu0 %v599_v0  ;;  %446 = vmatpush3.bf16.msra.mxu1 %v481_v30  ;;  %p574_p0 = pnand %p573_p13, %p567_p10 }
  0x3f   :  { %447 = vmatprep.subr.bf16.mxu1 %v599_v0 }
  0x41   :  { %428 = vmatpush3.bf16.msra.mxu0 %v473_v3 }
  0x42   :  { %429 = vmatprep.subr.bf16.mxu0 %v599_v0  ;;  %448 = vmatpush3.bf16.msra.mxu1 %v482_v31 }
  0x43   :  { %449 = vmatprep.subr.bf16.mxu1 %v599_v0 }
  0x45   :  { %430 = vmatpush3.bf16.msra.mxu0 %v474_v4 }
  0x46   :  { %431 = vmatprep.subr.bf16.mxu0 %v599_v0  ;;  %450 = vmatpush3.bf16.msra.mxu1 %v483_v32 }
  0x47   :  { %451 = vmatprep.subr.bf16.mxu1 %v599_v0 }
  0x49   :  { %432 = vmatpush3.bf16.msra.mxu0 %v475_v5 }
  0x4a   :  { %433 = vmatprep.subr.bf16.mxu0 %v599_v0  ;;  %452 = vmatpush3.bf16.msra.mxu1 %v484_v33 }
  0x4b   :  { %453 = vmatprep.subr.bf16.mxu1 %v599_v0 }
  0x4d   :  { %434 = vmatpush3.bf16.msra.mxu0 %v476_v6 }
  0x4e   :  { %435 = vmatprep.subr.bf16.mxu0 %v599_v0  ;;  %454 = vmatpush3.bf16.msra.mxu1 %v485_v34 }
  0x4f   :  { %455 = vmatprep.subr.bf16.mxu1 %v599_v0 }
  0x51   :  { %436 = vmatpush3.bf16.msra.mxu0 %v477_v7 }
  0x52   :  { %437 = vmatprep.subr.bf16.mxu0 %v599_v0  ;;  %456 = vmatpush3.bf16.msra.mxu1 %v486_v35 }
  0x53   :  { %457 = vmatprep.subr.bf16.mxu1 %v599_v0 }
  0x55   :  { %438 = vmatpush3.bf16.msra.mxu0 %v478_v8 }
  0x56   :  { %458 = vmatpush3.bf16.msra.mxu1 %v487_v36 }
  0x58   :  { %440 = vmatmul.mubr.bf16.vlgmr.msra.gmra.mrb[0].mxu0 %v479_v9 }
 0x12b   :  { %v171_v11 = vpop.f32.mrb[0].mxu0 }
 0x12c   :  { %v172_v12 = vadd.f32 %v373_v10, %v171_v11  ;;  %v441_v13 = vpop.f32.mrb[1].mxu0 }
 0x12d   :  { %v174_v14 = vpop.f32.mrb[2].mxu0 }
 0x12e   :  { %v383_v15 = vmul.f32 -1.442695, %v172_v12  ;;  %v175_v16 = vadd.f32 %v373_v10, %v174_v14  ;;  %v442_v17 = vpop.f32.mrb[3].mxu0 }
 0x130   :  { %488 = vpow2.f32 %v383_v15  ;;  %v384_v18 = vmul.f32 -1.442695, %v175_v16 }
 0x132   :  { %490 = vpow2.f32 %v384_v18 }
 0x13a   :  { %v489_v19 = vpop.eup %488 }
 0x13b   :  { %v184_v20 = vadd.f32 1.0, %v489_v19 }
 0x13c   :  { %v491_v21 = vpop.eup %490 }
 0x13d   :  { %492 = vrcp.f32 %v184_v20  ;;  %v185_v22 = vadd.f32 1.0, %v491_v21 }
 0x13f   :  { %494 = vrcp.f32 %v185_v22 }
 0x147   :  { %v493_v23 = vpop.eup %492 }
 0x148   :  { %v190_v24 = vmul.f32 %v493_v23, %v172_v12 }
 0x149   :  { %v495_v25 = vpop.eup %494 }
 0x14a   :  { %v191_v26 = vmul.f32 %v495_v25, %v175_v16  ;;  %192 = vadd.xlane.f32.xlu0 %v190_v24  ;;  %v198_v27 = vmul.f32 %v190_v24, %v190_v24 }
 0x14c   :  { %200 = vadd.xlane.f32.xlu1 %v198_v27  ;;  %v199_v28 = vmul.f32 %v191_v26, %v191_v26 }
 0x14e   :  { %194 = vadd.xlane.f32.xlu0 %v191_v26 }
 0x150   :  { %202 = vadd.xlane.f32.xlu1 %v199_v28 }
 0x1d7   :  { %v193_v37 = vpop.xlane.xlu0 %192 }
 0x1d8   :  { %v196_v38 = vmul.f32 0.03125, %v193_v37 }
 0x1d9   :  { %v201_v39 = vpop.xlane.xlu1 %200 }
 0x1da   :  { %v206_v40 = vmul.f32 %v196_v38, %v196_v38  ;;  %v204_v41 = vmul.f32 0.03125, %v201_v39  ;;  %v212_v53 = vsub.f32 %v190_v24, %v196_v38 }
 0x1db   :  { %v195_v42 = vpop.xlane.xlu0 %194 }
 0x1dc   :  { %v208_v43 = vsub.f32 %v204_v41, %v206_v40  ;;  %v197_v44 = vmul.f32 0.03125, %v195_v42 }
 0x1dd   :  { %v203_v45 = vpop.xlane.xlu1 %202 }
 0x1de   :  { %v210_v46 = vmax.f32 %v208_v43, 0.0  ;;  %v207_v47 = vmul.f32 %v197_v44, %v197_v44  ;;  %v205_v48 = vmul.f32 0.03125, %v203_v45  ;;  %v213_v57 = vsub.f32 %v191_v26, %v197_v44 }
 0x1e0   :  { %v214_v49 = vadd.f32 1e-05, %v210_v46  ;;  %v209_v50 = vsub.f32 %v205_v48, %v207_v47 }
 0x1e2   :  { %496 = vrsqrt.f32 %v214_v49  ;;  %v211_v51 = vmax.f32 %v209_v50, 0.0 }
 0x1e4   :  { %v215_v52 = vadd.f32 1e-05, %v211_v51 }
 0x1e6   :  { %498 = vrsqrt.f32 %v215_v52 }
 0x1ec   :  { %v497_v54 = vpop.eup %496 }
 0x1ed   :  { %v218_v55 = vmul.f32 %v497_v54, %v212_v53 }
 0x1ef   :  { %v225_v60 = vmul.f32 %v385_v56, %v218_v55 }
 0x1f0   :  { %v499_v58 = vpop.eup %498 }
 0x1f1   :  { %v219_v59 = vmul.f32 %v499_v58, %v213_v57  ;;  %v232_v63 = vadd.f32 %v386_v61, %v225_v60 }
 0x1f3   :  { %v226_v62 = vmul.f32 %v385_v56, %v219_v59 }
 0x1f5   :  { %v233_v0 = vadd.f32 %v386_v61, %v226_v62 }
 0x1f7   :  { %v234_v1 = vpack.c.bf16 %v233_v0, %v232_v63 }
 0x1f9   :  { %460 = vmatmul.mubr.bf16.vlgmr.msra.gmra.mrb[0].mxu1 %v234_v1 }
 0x2cc   :  { %v338_v3 = vpop.f32.mrb[0].mxu1 }
 0x2cd   :  { %v461_v4 = vpop.f32.mrb[1].mxu1  ;;  %v339_v6 = vadd.f32 %v387_v2, %v338_v3 }
 0x2ce   :  { %v341_v5 = vpop.f32.mrb[2].mxu1 }
 0x2cf   :  { %v342_v7 = vadd.f32 %v387_v2, %v341_v5  ;;  %v462_v8 = vpop.f32.mrb[3].mxu1 }
 0x2d1   :  { %v403_v9 = vpack.c.bf16 %v342_v7, %v339_v6 }
 0x2d3   :  { %404 = vst [vmem:[#allocation8] sm:$0xff] %v403_v9  }
 0x2d4   :  { %577 = shalt.err (!%p574_p0)
}
 0x2d5   :  { %s578_s12 = scalar_lea.hbm %s728_s4, 128 }
 0x2d6   :  { %p579_p1 = scmp.ne.s32.totalorder %s728_s4, %s578_s12  ;;  %p582_p2 = scmp.lt.u32.totalorder %s578_s12, %s728_s4 }
 0x2d8   :  { %p584_p3 = pnand %p582_p2, %p579_p1 }
 0x2da   :  { %587 = shalt.err (!%p584_p3)
}
 0x2db   :  { %366 = dma.vmem_to_hbm [thread:$0]  %s361_s9, 128, %s728_s4, [#allocation4], %s596_s27, %s596_s27, %s597_s28  }
 0x2dc   :  { %592 = dma.done.wait [#allocation4], 128  }
 0x2dd   :  { %593 = vsyncadd [#allocation4], 4294967168 }
 0x2de   :  { %370 = vsyncpa [#allocation3], 1 }
 0x2df   :  { %371 = vsyncpa [#allocation6], 1 }
 0x2e0   :  { %372 = vsyncpa [#allocation4], 1 }

// kernel: tpu_custom_call.1
= control target key start
LH: loop header
LB: loop body
LE: loop exit
PB: predicated region body
PF: predicated region fallthrough
CT: control target
= control target key end

     0   :  { %9 = vsyncpa [#allocation3], 0  ;;  %s724_s0 = inlined_call_operand.hbm [shape: bf16[16,128], index: 0, kind: input, shape index: {}]   ;;  %s725_s1 = inlined_call_operand.hbm [shape: bf16[128,128], index: 1, kind: input, shape index: {}]   ;;  %s726_s2 = inlined_call_operand.vmem [shape: f32[4,128], index: 2, kind: input, shape index: {}]   ;;  %s727_s3 = inlined_call_operand.hbm [shape: bf16[128,128], index: 3, kind: input, shape index: {}]   ;;  %s728_s4 = inlined_call_operand.hbm [shape: bf16[16,128], index: 4, kind: output, shape index: {}]  }
   0x1   :  { %10 = vsyncpa [#allocation6], 0 }
   0x2   :  { %11 = vsyncpa [#allocation4], 0  ;;  %s594_s15 = smov [#allocation5]   ;;  %s595_s17 = smov [#allocation2]  }
   0x3   :  { %s29_s16 = sshll.u32 %s594_s15, 4  ;;  %s17_s18 = sshll.u32 %s595_s17, 4  ;;  %s30_s16 = int_to_ptr.vmem [resolvable:$true] %s29_s16  ;;  %s627_s18 = int_to_ptr.vmem [resolvable:$true] %s17_s18 }
   0x4   :  { %s500_s21 = scalar_lea.hbm %s725_s1, 1024 }
   0x5   :  { %p501_p0 = scmp.ne.s32.totalorder %s725_s1, %s500_s21  ;;  %p504_p1 = scmp.lt.u32.totalorder %s500_s21, %s725_s1 }
   0x7   :  { %p506_p2 = pnand %p504_p1, %p501_p0 }
   0x9   :  { %509 = shalt.err (!%p506_p2)
}
   0xa   :  { %s510_s26 = scalar_lea.vmem %s30_s16, 1024  ;;  %p515_p4 = scmp.lt.s32.totalorder %s30_s16, %s30_s16 }
   0xb   :  { %p511_p3 = scmp.ne.s32.totalorder %s30_s16, %s510_s26  ;;  %p516_p5 = scmp.lt.s32.totalorder %s510_s26, %s510_s26 }
   0xd   :  { %p517_p6 = por %p516_p5, %p515_p4 }
   0xf   :  { %p518_p7 = pnand %p517_p6, %p511_p3 }
  0x11   :  { %521 = shalt.err (!%p518_p7)
}
  0x12   :  { %s596_s27 = smov 64   ;;  %s597_s28 = smov 4  }
  0x13   :  { %35 = dma.hbm_to_vmem [thread:$0]  %s725_s1, 1024, %s30_s16, [#allocation6], %s596_s27, %s596_s27, %s597_s28  }
  0x14   :  { %s522_s7 = scalar_lea.hbm %s724_s0, 128 }
  0x15   :  { %p523_p8 = scmp.ne.s32.totalorder %s724_s0, %s522_s7  ;;  %p526_p9 = scmp.lt.u32.totalorder %s522_s7, %s724_s0 }
  0x17   :  { %p528_p10 = pnand %p526_p9, %p523_p8 }
  0x19   :  { %531 = shalt.err (!%p528_p10)
}
  0x1a   :  { %s532_s12 = scalar_lea.vmem %s627_s18, 128  ;;  %p537_p12 = scmp.lt.s32.totalorder %s627_s18, %s627_s18 }
  0x1b   :  { %p533_p11 = scmp.ne.s32.totalorder %s627_s18, %s532_s12  ;;  %p538_p13 = scmp.lt.s32.totalorder %s532_s12, %s532_s12 }
  0x1d   :  { %p539_p0 = por %p538_p13, %p537_p12 }
  0x1f   :  { %p540_p1 = pnand %p539_p0, %p533_p11 }
  0x21   :  { %543 = shalt.err (!%p540_p1)
}
  0x22   :  { %23 = dma.hbm_to_vmem [thread:$0]  %s724_s0, 128, %s627_s18, [#allocation3], %s596_s27, %s596_s27, %s597_s28  }
  0x23   :  { %s598_s14 = smov [#allocation7]   ;;  %s544_s19 = scalar_lea.hbm %s727_s3, 1024 }
  0x24   :  { %s43_s15 = sshll.u32 %s598_s14, 4  ;;  %p545_p2 = scmp.ne.s32.totalorder %s727_s3, %s544_s19  ;;  %s44_s15 = int_to_ptr.vmem [resolvable:$true] %s43_s15 }
  0x25   :  { %p548_p3 = scmp.lt.u32.totalorder %s544_s19, %s727_s3 }
  0x27   :  { %p550_p4 = pnand %p548_p3, %p545_p2 }
  0x29   :  { %553 = shalt.err (!%p550_p4)
}
  0x2a   :  { %s554_s24 = scalar_lea.vmem %s44_s15, 1024  ;;  %p559_p6 = scmp.lt.s32.totalorder %s44_s15, %s44_s15 }
  0x2b   :  { %p555_p5 = scmp.ne.s32.totalorder %s44_s15, %s554_s24  ;;  %p560_p7 = scmp.lt.s32.totalorder %s554_s24, %s554_s24 }
  0x2d   :  { %p561_p8 = por %p560_p7, %p559_p6 }
  0x2f   :  { %p562_p9 = pnand %p561_p8, %p555_p5 }
  0x31   :  { %565 = shalt.err (!%p562_p9)
}
  0x32   :  { %49 = dma.hbm_to_vmem [thread:$0]  %s727_s3, 1024, %s44_s15, [#allocation6], %s596_s27, %s596_s27, %s597_s28  }
  0x33   :  { %588 = dma.done.wait [#allocation3], 128  }
  0x34   :  { %589 = vsyncadd [#allocation3], 4294967168 }
  0x35   :  { %590 = dma.done.wait [#allocation6], 2048  }
  0x36   :  { %591 = vsyncadd [#allocation6], 4294965248  ;;  %v599_v0 = vmov 0.0   ;;  %vm600_vm0 = vmmov 0   ;;  %v471_v1 = vld [vmem:[#allocation5] sm:$0xff]   ;;  %v472_v2 = vld [vmem:[#allocation5 + $0x8] sm:$0xff]  }
  0x37   :  { %423 = vmatprep.subr.bf16.mxu0 %v599_v0  ;;  %439 = vmatprep.mubr.msk.bf16.mxu0 %vm600_vm0, %v599_v0  ;;  %v473_v3 = vld [vmem:[#allocation5 + $0x10] sm:$0xff]   ;;  %v474_v4 = vld [vmem:[#allocation5 + $0x18] sm:$0xff]   ;;  %v475_v5 = vld [vmem:[#allocation5 + $0x20] sm:$0xff]   ;;  %s601_s8 = smov [#allocation8]  }
  0x38   :  { %443 = vmatprep.subr.bf16.mxu1 %v599_v0  ;;  %459 = vmatprep.mubr.msk.bf16.mxu1 %vm600_vm0, %v599_v0  ;;  %v476_v6 = vld [vmem:[#allocation5 + $0x28] sm:$0xff]   ;;  %v477_v7 = vld [vmem:[#allocation5 + $0x30] sm:$0xff]   ;;  %v478_v8 = vld [vmem:[#allocation5 + $0x38] sm:$0xff]   ;;  %s360_s9 = sshll.u32 %s601_s8, 4  ;;  %s361_s9 = int_to_ptr.vmem [resolvable:$true] %s360_s9 }
  0x39   :  { %424 = vmatpush3.bf16.msra.mxu0 %v471_v1  ;;  %v479_v9 = vld [vmem:[#allocation2] sm:$0xff]   ;;  %v480_v29 = vld [vmem:[#allocation7] sm:$0xff]   ;;  %v481_v30 = vld [vmem:[#allocation7 + $0x8] sm:$0xff]   ;;  %s566_s10 = scalar_lea.vmem %s361_s9, 128  ;;  %p571_p11 = scmp.lt.s32.totalorder %s361_s9, %s361_s9 }
  0x3a   :  { %425 = vmatprep.subr.bf16.mxu0 %v599_v0  ;;  %v373_v10 = vld [vmem:[%s726_s2] ss:$0 sm:$0xff]  ;;  %444 = vmatpush3.bf16.msra.mxu1 %v480_v29  ;;  %v482_v31 = vld [vmem:[#allocation7 + $0x10] sm:$0xff]   ;;  %v484_v33 = vld [vmem:[#allocation7 + $0x20] sm:$0xff]   ;;  %p567_p10 = scmp.ne.s32.totalorder %s361_s9, %s566_s10  ;;  %p572_p12 = scmp.lt.s32.totalorder %s566_s10, %s566_s10 }
  0x3b   :  { %445 = vmatprep.subr.bf16.mxu1 %v599_v0  ;;  %v483_v32 = vld [vmem:[#allocation7 + $0x18] sm:$0xff]   ;;  %v485_v34 = vld [vmem:[#allocation7 + $0x28] sm:$0xff]   ;;  %v486_v35 = vld [vmem:[#allocation7 + $0x30] sm:$0xff]  }
  0x3c   :  { %v487_v36 = vld [vmem:[#allocation7 + $0x38] sm:$0xff]   ;;  %p573_p13 = por %p572_p12, %p571_p11 }
  0x3d   :  { %426 = vmatpush3.bf16.msra.mxu0 %v472_v2  ;;  %v385_v56 = vld [vmem:[%s726_s2 + $0x1] ss:$0 sm:$0xff]  ;;  %v386_v61 = vld [vmem:[%s726_s2 + $0x2] ss:$0 sm:$0xff]  ;;  %v387_v2 = vld [vmem:[%s726_s2 + $0x3] ss:$0 sm:$0xff] }
  0x3e   :  { %427 = vmatprep.subr.bf16.mxu0 %v599_v0  ;;  %446 = vmatpush3.bf16.msra.mxu1 %v481_v30  ;;  %p574_p0 = pnand %p573_p13, %p567_p10 }
  0x3f   :  { %447 = vmatprep.subr.bf16.mxu1 %v599_v0 }
  0x41   :  { %428 = vmatpush3.bf16.msra.mxu0 %v473_v3 }
  0x42   :  { %429 = vmatprep.subr.bf16.mxu0 %v599_v0  ;;  %448 = vmatpush3.bf16.msra.mxu1 %v482_v31 }
  0x43   :  { %449 = vmatprep.subr.bf16.mxu1 %v599_v0 }
  0x45   :  { %430 = vmatpush3.bf16.msra.mxu0 %v474_v4 }
  0x46   :  { %431 = vmatprep.subr.bf16.mxu0 %v599_v0  ;;  %450 = vmatpush3.bf16.msra.mxu1 %v483_v32 }
  0x47   :  { %451 = vmatprep.subr.bf16.mxu1 %v599_v0 }
  0x49   :  { %432 = vmatpush3.bf16.msra.mxu0 %v475_v5 }
  0x4a   :  { %433 = vmatprep.subr.bf16.mxu0 %v599_v0  ;;  %452 = vmatpush3.bf16.msra.mxu1 %v484_v33 }
  0x4b   :  { %453 = vmatprep.subr.bf16.mxu1 %v599_v0 }
  0x4d   :  { %434 = vmatpush3.bf16.msra.mxu0 %v476_v6 }
  0x4e   :  { %435 = vmatprep.subr.bf16.mxu0 %v599_v0  ;;  %454 = vmatpush3.bf16.msra.mxu1 %v485_v34 }
  0x4f   :  { %455 = vmatprep.subr.bf16.mxu1 %v599_v0 }
  0x51   :  { %436 = vmatpush3.bf16.msra.mxu0 %v477_v7 }
  0x52   :  { %437 = vmatprep.subr.bf16.mxu0 %v599_v0  ;;  %456 = vmatpush3.bf16.msra.mxu1 %v486_v35 }
  0x53   :  { %457 = vmatprep.subr.bf16.mxu1 %v599_v0 }
  0x55   :  { %438 = vmatpush3.bf16.msra.mxu0 %v478_v8 }
  0x56   :  { %458 = vmatpush3.bf16.msra.mxu1 %v487_v36 }
  0x58   :  { %440 = vmatmul.mubr.bf16.vlgmr.msra.gmra.mrb[0].mxu0 %v479_v9 }
 0x12b   :  { %v171_v11 = vpop.f32.mrb[0].mxu0 }
 0x12c   :  { %v172_v12 = vadd.f32 %v373_v10, %v171_v11  ;;  %v441_v13 = vpop.f32.mrb[1].mxu0 }
 0x12d   :  { %v174_v14 = vpop.f32.mrb[2].mxu0 }
 0x12e   :  { %v383_v15 = vmul.f32 -1.442695, %v172_v12  ;;  %v175_v16 = vadd.f32 %v373_v10, %v174_v14  ;;  %v442_v17 = vpop.f32.mrb[3].mxu0 }
 0x130   :  { %488 = vpow2.f32 %v383_v15  ;;  %v384_v18 = vmul.f32 -1.442695, %v175_v16 }
 0x132   :  { %490 = vpow2.f32 %v384_v18 }
 0x13a   :  { %v489_v19 = vpop.eup %488 }
 0x13b   :  { %v184_v20 = vadd.f32 1.0, %v489_v19 }
 0x13c   :  { %v491_v21 = vpop.eup %490 }
 0x13d   :  { %492 = vrcp.f32 %v184_v20  ;;  %v185_v22 = vadd.f32 1.0, %v491_v21 }
 0x13f   :  { %494 = vrcp.f32 %v185_v22 }
 0x147   :  { %v493_v23 = vpop.eup %492 }
 0x148   :  { %v190_v24 = vmul.f32 %v493_v23, %v172_v12 }
 0x149   :  { %v495_v25 = vpop.eup %494 }
 0x14a   :  { %v191_v26 = vmul.f32 %v495_v25, %v175_v16  ;;  %192 = vadd.xlane.f32.xlu0 %v190_v24  ;;  %v198_v27 = vmul.f32 %v190_v24, %v190_v24 }
 0x14c   :  { %200 = vadd.xlane.f32.xlu1 %v198_v27  ;;  %v199_v28 = vmul.f32 %v191_v26, %v191_v26 }
 0x14e   :  { %194 = vadd.xlane.f32.xlu0 %v191_v26 }
 0x150   :  { %202 = vadd.xlane.f32.xlu1 %v199_v28 }
 0x1d7   :  { %v193_v37 = vpop.xlane.xlu0 %192 }
 0x1d8   :  { %v196_v38 = vmul.f32 0.03125, %v193_v37 }
 0x1d9   :  { %v201_v39 = vpop.xlane.xlu1 %200 }
 0x1da   :  { %v206_v40 = vmul.f32 %v196_v38, %v196_v38  ;;  %v204_v41 = vmul.f32 0.03125, %v201_v39  ;;  %v212_v53 = vsub.f32 %v190_v24, %v196_v38 }
 0x1db   :  { %v195_v42 = vpop.xlane.xlu0 %194 }
 0x1dc   :  { %v208_v43 = vsub.f32 %v204_v41, %v206_v40  ;;  %v197_v44 = vmul.f32 0.03125, %v195_v42 }
 0x1dd   :  { %v203_v45 = vpop.xlane.xlu1 %202 }
 0x1de   :  { %v210_v46 = vmax.f32 %v208_v43, 0.0  ;;  %v207_v47 = vmul.f32 %v197_v44, %v197_v44  ;;  %v205_v48 = vmul.f32 0.03125, %v203_v45  ;;  %v213_v57 = vsub.f32 %v191_v26, %v197_v44 }
 0x1e0   :  { %v214_v49 = vadd.f32 1e-05, %v210_v46  ;;  %v209_v50 = vsub.f32 %v205_v48, %v207_v47 }
 0x1e2   :  { %496 = vrsqrt.f32 %v214_v49  ;;  %v211_v51 = vmax.f32 %v209_v50, 0.0 }
 0x1e4   :  { %v215_v52 = vadd.f32 1e-05, %v211_v51 }
 0x1e6   :  { %498 = vrsqrt.f32 %v215_v52 }
 0x1ec   :  { %v497_v54 = vpop.eup %496 }
 0x1ed   :  { %v218_v55 = vmul.f32 %v497_v54, %v212_v53 }
 0x1ef   :  { %v225_v60 = vmul.f32 %v385_v56, %v218_v55 }
 0x1f0   :  { %v499_v58 = vpop.eup %498 }
 0x1f1   :  { %v219_v59 = vmul.f32 %v499_v58, %v213_v57  ;;  %v232_v63 = vadd.f32 %v386_v61, %v225_v60 }
 0x1f3   :  { %v226_v62 = vmul.f32 %v385_v56, %v219_v59 }
 0x1f5   :  { %v233_v0 = vadd.f32 %v386_v61, %v226_v62 }
 0x1f7   :  { %v234_v1 = vpack.c.bf16 %v233_v0, %v232_v63 }
 0x1f9   :  { %460 = vmatmul.mubr.bf16.vlgmr.msra.gmra.mrb[0].mxu1 %v234_v1 }
 0x2cc   :  { %v338_v3 = vpop.f32.mrb[0].mxu1 }
 0x2cd   :  { %v461_v4 = vpop.f32.mrb[1].mxu1  ;;  %v339_v6 = vadd.f32 %v387_v2, %v338_v3 }
 0x2ce   :  { %v341_v5 = vpop.f32.mrb[2].mxu1 }
 0x2cf   :  { %v342_v7 = vadd.f32 %v387_v2, %v341_v5  ;;  %v462_v8 = vpop.f32.mrb[3].mxu1 }
 0x2d1   :  { %v403_v9 = vpack.c.bf16 %v342_v7, %v339_v6 }
 0x2d3   :  { %404 = vst [vmem:[#allocation8] sm:$0xff] %v403_v9  }
 0x2d4   :  { %577 = shalt.err (!%p574_p0)
}
 0x2d5   :  { %s578_s12 = scalar_lea.hbm %s728_s4, 128 }
 0x2d6   :  { %p579_p1 = scmp.ne.s32.totalorder %s728_s4, %s578_s12  ;;  %p582_p2 = scmp.lt.u32.totalorder %s578_s12, %s728_s4 }
 0x2d8   :  { %p584_p3 = pnand %p582_p2, %p579_p1 }
 0x2da   :  { %587 = shalt.err (!%p584_p3)
}
 0x2db   :  { %366 = dma.vmem_to_hbm [thread:$0]  %s361_s9, 128, %s728_s4, [#allocation4], %s596_s27, %s596_s27, %s597_s28  }
 0x2dc   :  { %592 = dma.done.wait [#allocation4], 128  }
 0x2dd   :  { %593 = vsyncadd [#allocation4], 4294967168 }
 0x2de   :  { %370 = vsyncpa [#allocation3], 1 }
 0x2df   :  { %371 = vsyncpa [#allocation6], 1 }
 0x2e0   :  { %372 = vsyncpa [#allocation4], 1 }

</bundles_post_ra>
